<compile_context>
chip_gen: v7x
topology: tpu7x:2x2x1
jax: 0.10.0
libtpu: 0.0.40
codegen_flags: <defaults>
</compile_context>

<pallas_src>
import functools

import jax
import jax.numpy as jnp
from jax import lax
from jax.experimental import pallas as pl
from jax.experimental.pallas import tpu as pltpu

EPS_BN = 1e-5
# Actual per-call VMEM peak in this model is < 4 MiB; 16 MiB leaves generous
# headroom (well inside v7x's 64 MiB physical VMEM, and leaves room for XLA's
# surrounding fusions / the second TensorCore's working set).
VMEM_LIMIT = 16 * 1024 * 1024


def _round_up(x, m):
    return (x + m - 1) // m * m


# ----------------------------- Pallas kernels ------------------------------

def _conv3x3_kernel(*refs, img_w, npad, relu, has_res):
    """Direct 3x3 stride-1 conv for one (batch, out-channel-tile) grid step.

    The unpadded NHWC image arrives flattened as (H*W, C).  At the first
    output-channel tile of each image (j == 0) the kernel:
      1. zero-pads it into an (R, C) VMEM scratch (W+1 zero rows on each side
         of the flat buffer handle the vertical borders);
      2. builds a tap-concatenated (H*W, 9*C) im2col operand in a second VMEM
         scratch with 9 shifted slice copies (horizontal borders are masked).
    Every grid step then issues ONE K=9*C matmul against its (9*C, tn) weight
    tile and fuses bias (+residual) (+ReLU) into the store.  No f32 scratch
    read-modify-write, no HBM im2col, no garbage columns.
    """
    if has_res:
        x_ref, w_ref, bias_ref, res_ref, o_ref, xpad_ref, col_ref = refs
    else:
        x_ref, w_ref, bias_ref, o_ref, xpad_ref, col_ref = refs
        res_ref = None
    m = o_ref.shape[0]            # H*W valid output pixels
    c = x_ref.shape[-1]

    @pl.when(pl.program_id(1) == 0)
    def _():
        xpad_ref[...] = jnp.zeros_like(xpad_ref)
        xpad_ref[pl.ds(npad, m), :] = x_ref[...]
        ow = lax.broadcasted_iota(jnp.int32, (m, 1), 0) % img_w
        for ky in range(3):
            for kx in range(3):
                tap = ky * 3 + kx
                shift = (ky - 1) * img_w + (kx - 1)
                piece = xpad_ref[pl.ds(npad + shift, m), :]
                if kx == 0:       # left border would wrap -> zero it
                    piece = jnp.where(ow != 0, piece, jnp.zeros_like(piece))
                elif kx == 2:     # right border would wrap -> zero it
                    piece = jnp.where(ow != img_w - 1, piece,
                                      jnp.zeros_like(piece))
                col_ref[:, tap * c:(tap + 1) * c] = piece

    acc = jnp.dot(col_ref[...], w_ref[...], preferred_element_type=jnp.float32)
    acc = acc + bias_ref[...]
    if has_res:
        acc = acc + res_ref[...].astype(jnp.float32)
    if relu:
        acc = jnp.maximum(acc, 0.0)
    o_ref[...] = acc.astype(o_ref.dtype)


def conv3x3_bn(x, p, stride, relu, residual=None):
    """3x3 conv (+folded BN) (+residual) (+ReLU).  x: (B,H,W,C) bf16 NHWC."""
    B, H, W, C = x.shape
    N = p["w"].shape[-1]
    M = H * W
    npad = W + 1                                   # flat zero pad rows per side
    R = _round_up(M + 2 * npad, 8)
    tn = 128 if N % 128 == 0 else N                # output-channel tile

    xf = x.reshape(B, M, C)
    args = [xf, p["w"], p["bias"]]
    in_specs = [
        pl.BlockSpec((None, M, C), lambda b, j: (b, 0, 0)),
        pl.BlockSpec((9 * C, tn), lambda b, j: (0, j)),
        pl.BlockSpec((1, tn), lambda b, j: (0, j)),
    ]
    has_res = residual is not None
    if has_res:
        assert stride == 1
        args.append(residual.reshape(B, M, N))
        in_specs.append(pl.BlockSpec((None, M, tn), lambda b, j: (b, 0, j)))

    out = pl.pallas_call(
        functools.partial(_conv3x3_kernel, img_w=W, npad=npad,
                          relu=relu, has_res=has_res),
        out_shape=jax.ShapeDtypeStruct((B, M, N), jnp.bfloat16),
        grid=(B, N // tn),
        in_specs=in_specs,
        out_specs=pl.BlockSpec((None, M, tn), lambda b, j: (b, 0, j)),
        scratch_shapes=[pltpu.VMEM((R, C), jnp.bfloat16),       # padded rows
                        pltpu.VMEM((M, 9 * C), jnp.bfloat16)],  # im2col operand
        compiler_params=pltpu.CompilerParams(
            # b is 'parallel' (megacore / 2nd v7x TC); the N-tile axis must be
            # 'arbitrary' so the j==0 im2col build is always executed first.
            dimension_semantics=("parallel", "arbitrary"),
            vmem_limit_bytes=VMEM_LIMIT),
    )(*args)
    out = out.reshape(B, H, W, N)
    if stride > 1:
        # TODO(synk): compute only the strided outputs in-kernel (strided
        # pl.ds reads in the im2col build) instead of dense compute + slice.
        out = out[:, ::stride, ::stride, :]
    return out


def _matmul_kernel(x_ref, w_ref, bias_ref, o_ref, acc_ref, *, relu):
    @pl.when(pl.program_id(2) == 0)
    def _():
        acc_ref[...] = jnp.zeros_like(acc_ref)
    acc_ref[...] += jnp.dot(x_ref[...], w_ref[...],
                            preferred_element_type=jnp.float32)

    @pl.when(pl.program_id(2) == pl.num_programs(2) - 1)
    def _():
        acc = acc_ref[...] + bias_ref[...]
        if relu:
            acc = jnp.maximum(acc, 0.0)
        o_ref[...] = acc.astype(o_ref.dtype)


def fused_matmul(x, w, bias, relu=False, out_dtype=jnp.float32):
    """y = [relu](x @ w + bias).  x:(M,K); w:(K,N) bf16 (BN folded); bias:(1,N) f32."""
    M, K = x.shape
    N = w.shape[1]
    x = x.astype(jnp.bfloat16)

    mp = _round_up(M, 8)
    tm = min(mp, 512)
    mp = _round_up(mp, tm)
    np_ = _round_up(N, 128)        # lane-dense output slabs
    tn = min(np_, 512)
    np_ = _round_up(np_, tn)
    tk = K if K <= 1024 else 512   # single K step at this model's sizes
    kp = _round_up(K, tk)

    if (mp, kp) != (M, K):
        x = jnp.pad(x, ((0, mp - M), (0, kp - K)))
    if (kp, np_) != (K, N):
        w = jnp.pad(w, ((0, kp - K), (0, np_ - N)))
    if np_ != N:
        bias = jnp.pad(bias, ((0, 0), (0, np_ - N)))

    out = pl.pallas_call(
        functools.partial(_matmul_kernel, relu=relu),
        out_shape=jax.ShapeDtypeStruct((mp, np_), out_dtype),
        grid=(mp // tm, np_ // tn, kp // tk),
        in_specs=[
            pl.BlockSpec((tm, tk), lambda i, j, k: (i, k)),
            pl.BlockSpec((tk, tn), lambda i, j, k: (k, j)),
            pl.BlockSpec((1, tn), lambda i, j, k: (0, j)),
        ],
        out_specs=pl.BlockSpec((tm, tn), lambda i, j, k: (i, j)),
        scratch_shapes=[pltpu.VMEM((tm, tn), jnp.float32)],
        compiler_params=pltpu.CompilerParams(
            dimension_semantics=("parallel", "parallel", "arbitrary"),
            vmem_limit_bytes=VMEM_LIMIT),
    )(x, w, bias)
    return out[:M, :N]


def stem_conv(x, p):
    """conv1 (3->64, 3x3, s=1) + folded BN + ReLU as one K=27 tap-concat matmul.

    The tap concat (im2col) of the tiny 3-channel input is done in XLA — its
    HBM cost is negligible — which keeps the Pallas conv kernel to
    lane-friendly C>=64 and gives the stem a K=27 MXU pass instead of 9 K=3.
    """
    B, H, W, C = x.shape
    xp = jnp.pad(x, ((0, 0), (1, 1), (1, 1), (0, 0)))
    cols = jnp.concatenate(
        [xp[:, ky:ky + H, kx:kx + W, :] for ky in range(3) for kx in range(3)],
        axis=-1)                                   # (B,H,W,9*C), tap-major
    y = fused_matmul(cols.reshape(B * H * W, 9 * C), p["w"], p["bias"],
                     relu=True, out_dtype=jnp.bfloat16)
    return y.reshape(B, H, W, -1)


def conv1x1_bn(x, p, stride):
    """1x1 conv (+folded BN): spatial subsample + fused matmul (no im2col)."""
    if stride > 1:
        x = x[:, ::stride, ::stride, :]
    B, Ho, Wo, C = x.shape
    y = fused_matmul(x.reshape(B * Ho * Wo, C), p["w"], p["bias"],
                     relu=False, out_dtype=jnp.bfloat16)
    return y.reshape(B, Ho, Wo, -1)


def _tail_kernel(x_ref, wfc_ref, bfc_ref, w1_ref, b1_ref, w2_ref, b2_ref,
                 feat_ref, featn_ref, glog_ref, plog_ref):
    """Fused tail: avg-pool + L2-normalize + fc + 2-layer personalized head."""
    x = x_ref[...].astype(jnp.float32)                 # (B, H*W, C)
    feat = jnp.sum(x, axis=1) * (1.0 / x.shape[1])     # adaptive avg pool 1x1
    feat_ref[...] = feat
    sq = jnp.sum(feat * feat, axis=1, keepdims=True)
    norm = jnp.maximum(jnp.sqrt(sq), 1e-12)            # F.normalize(p=2, dim=1)
    featn = feat / norm
    featn_ref[...] = featn
    glog_ref[...] = (jnp.dot(feat.astype(jnp.bfloat16), wfc_ref[...],
                             preferred_element_type=jnp.float32) + bfc_ref[...])
    h = jnp.dot(featn.astype(jnp.bfloat16), w1_ref[...],
                preferred_element_type=jnp.float32) + b1_ref[...]
    h = jnp.maximum(h, 0.0)                            # Linear -> BN(folded) -> ReLU
    plog_ref[...] = (jnp.dot(h.astype(jnp.bfloat16), w2_ref[...],
                             preferred_element_type=jnp.float32) + b2_ref[...])


def tail_head(x_nhwc, fc, ph1, ph2):
    B, H, W, C = x_nhwc.shape
    S = H * W
    x = x_nhwc.reshape(B, S, C)
    n_cls = fc["w"].shape[1]

    def full(shape):
        return pl.BlockSpec(shape, lambda i, _s=shape: tuple(0 for _ in _s))

    return pl.pallas_call(
        _tail_kernel,
        out_shape=(jax.ShapeDtypeStruct((B, C), jnp.float32),
                   jax.ShapeDtypeStruct((B, C), jnp.float32),
                   jax.ShapeDtypeStruct((B, n_cls), jnp.float32),
                   jax.ShapeDtypeStruct((B, n_cls), jnp.float32)),
        grid=(1,),
        in_specs=[full((B, S, C)),
                  full(fc["w"].shape), full(fc["bias"].shape),
                  full(ph1["w"].shape), full(ph1["bias"].shape),
                  full(ph2["w"].shape), full(ph2["bias"].shape)],
        out_specs=(full((B, C)), full((B, C)),
                   full((B, n_cls)), full((B, n_cls))),
        compiler_params=pltpu.CompilerParams(
            dimension_semantics=("arbitrary",),
            vmem_limit_bytes=VMEM_LIMIT),
    )(x, fc["w"], fc["bias"], ph1["w"], ph1["bias"], ph2["w"], ph2["bias"])


# ------------------------------- parameters --------------------------------

def bn_fold(c):
    # Placeholder running stats (gamma=1, beta=0, mean=0, var=1).  Real
    # checkpoints must plug actual statistics in before this fold.
    gamma = jnp.ones((c,), jnp.float32)
    beta = jnp.zeros((c,), jnp.float32)
    mean = jnp.zeros((c,), jnp.float32)
    var = jnp.ones((c,), jnp.float32)
    scale = gamma / jnp.sqrt(var + EPS_BN)
    return scale, beta - mean * scale


def conv3x3_params(key, cin, cout):
    # kaiming_normal_(mode='fan_out', nonlinearity='relu')
    std = (2.0 / (cout * 9)) ** 0.5
    w = jax.random.normal(key, (cout, cin, 3, 3), jnp.float32) * std   # OIHW
    scale, bias = bn_fold(cout)
    # (ky, kx, cin, cout) flattened tap-major / channel-minor -> (9*cin, cout)
    w = jnp.transpose(w, (2, 3, 1, 0)).reshape(9 * cin, cout)
    w = (w * scale).astype(jnp.bfloat16)                 # fold BN scale into W
    return {"w": w, "bias": bias.reshape(1, cout)}


def conv1x1_params(key, cin, cout):
    std = (2.0 / cout) ** 0.5
    w = jax.random.normal(key, (cout, cin), jnp.float32) * std
    scale, bias = bn_fold(cout)
    w = (w.T * scale).astype(jnp.bfloat16)
    return {"w": w, "bias": bias.reshape(1, cout)}


def linear_params(key, cin, cout, with_bn=False):
    # kaiming_normal_(mode='fan_out'); bias zero
    std = (2.0 / cout) ** 0.5
    w = jax.random.normal(key, (cout, cin), jnp.float32) * std
    b = jnp.zeros((cout,), jnp.float32)
    wt = w.T
    if with_bn:
        s, bb = bn_fold(cout)
        wt = wt * s
        bias = b * s + bb            # fold linear bias through BN
    else:
        bias = b
    return {"w": wt.astype(jnp.bfloat16), "bias": bias.reshape(1, cout)}


def basic_block_params(key, in_planes, planes, stride):
    k1, k2, k3 = jax.random.split(key, 3)
    p = {"stride": stride,
         "conv1": conv3x3_params(k1, in_planes, planes),
         "conv2": conv3x3_params(k2, planes, planes)}
    if stride != 1 or in_planes != planes:          # expansion = 1
        p["shortcut"] = conv1x1_params(k3, in_planes, planes)
    return p


def make_resnet_params(key, num_blocks=(1, 1, 1, 1), num_classes=10,
                       last_feature_dim=512):
    keys = jax.random.split(key, 4 + sum(num_blocks))
    ki = iter(keys)
    params = {"conv1": conv3x3_params(next(ki), 3, 64)}
    in_planes = 64
    plane_list = [64, 128, 256, last_feature_dim]
    for li, (planes, nb, stride) in enumerate(
            zip(plane_list, num_blocks, [1, 2, 2, 2]), start=1):
        blocks = []
        for s in [stride] + [1] * (nb - 1):
            blocks.append(basic_block_params(next(ki), in_planes, planes, s))
            in_planes = planes
        params[f"layer{li}"] = blocks
    feature_dim = last_feature_dim                  # expansion = 1 (BasicBlock)
    params["fc"] = linear_params(next(ki), feature_dim, num_classes)
    # personalized head (personalization_layers=2): Linear -> BN1d -> ReLU -> Linear
    params["phead1"] = linear_params(next(ki), feature_dim, feature_dim, with_bn=True)
    params["phead2"] = linear_params(next(ki), feature_dim, num_classes)
    params["temperature"] = jnp.ones((1,), jnp.float32) * 0.07
    params["hybrid_factor"] = jnp.float32(0.5)
    return params


# --------------------------------- forward ---------------------------------

def basic_block_forward(x, p):
    out = conv3x3_bn(x, p["conv1"], p["stride"], relu=True)
    if "shortcut" in p:
        sc = conv1x1_bn(x, p["shortcut"], p["stride"])
    else:
        sc = x
    # conv2 + BN2 + residual add + final ReLU fused in one Pallas call
    return conv3x3_bn(out, p["conv2"], 1, relu=True, residual=sc)


def resnet_forward(params, x_nchw, use_personalized_head=True, hybrid_mode=False,
                   include_intermediate_layers=True):
    results = {}
    # Single cast at model entry; activations stay bf16 (MXU-native) end to end.
    x = jnp.transpose(x_nchw, (0, 2, 3, 1)).astype(jnp.bfloat16)   # NCHW -> NHWC
    out = stem_conv(x, params["conv1"])                            # conv1+bn1+relu
    # Per-layer NCHW copies are only materialized when requested (they are
    # part of the PyTorch results dict, hence default True).
    if include_intermediate_layers:
        results["layer0"] = jnp.transpose(out, (0, 3, 1, 2))
    for li in range(1, 5):
        for bp in params[f"layer{li}"]:
            out = basic_block_forward(out, bp)
        if include_intermediate_layers:
            results[f"layer{li}"] = jnp.transpose(out, (0, 3, 1, 2))

    # Fused tail: pool + L2 norm + fc + personalized head in one pallas_call.
    features, features_normalized, global_logit, personalized_logit = tail_head(
        out, params["fc"], params["phead1"], params["phead2"])

    if hybrid_mode:
        hf = jax.nn.sigmoid(params["hybrid_factor"])
        default_logit = hf * personalized_logit + (1.0 - hf) * global_logit
    else:
        default_logit = personalized_logit if use_personalized_head else global_logit

    results.update({
        "feature": features,
        "feature_normalized": features_normalized,
        "global_logit": global_logit,
        "personalized_logit": personalized_logit,
        "logit": default_logit,
        "use_personalized": use_personalized_head,
        "temperature": params["temperature"],
        "trust_score": 1.0,
    })
    return results


if __name__ == "__main__":
    key = jax.random.PRNGKey(0)
    pkey, xkey = jax.random.split(key)
    params = make_resnet_params(pkey, num_blocks=(1, 1, 1, 1), num_classes=10,
                                last_feature_dim=512)
    x = jax.random.normal(xkey, (2, 3, 16, 16), jnp.float32)   # NCHW, like PyTorch
    results = resnet_forward(params, x)
    jax.block_until_ready(results["logit"])
    jax.block_until_ready(results["layer4"])
    assert results["logit"].shape == (2, 10)
    assert results["global_logit"].shape == (2, 10)
    assert results["personalized_logit"].shape == (2, 10)
    assert results["feature"].shape == (2, 512)
    assert results["feature_normalized"].shape == (2, 512)
    assert results["layer0"].shape == (2, 64, 16, 16)
    assert results["layer1"].shape == (2, 64, 16, 16)
    assert results["layer2"].shape == (2, 128, 8, 8)
    assert results["layer3"].shape == (2, 256, 4, 4)
    assert results["layer4"].shape == (2, 512, 2, 2)
    assert bool(jnp.all(jnp.isfinite(results["logit"])))
    assert bool(jnp.all(jnp.isfinite(results["global_logit"])))
    print("KERNEL_OK")
</pallas_src>

<mosaic_0001>
module attributes {stable_mosaic.version = 11 : i64} {
  func.func @_matmul_kernel(%arg0: i32, %arg1: i32, %arg2: i32, %arg3: memref<512x27xbf16, #tpu.memory_space<vmem>>, %arg4: memref<27x128xbf16, #tpu.memory_space<vmem>>, %arg5: memref<1x128xf32, #tpu.memory_space<vmem>>, %arg6: memref<512x128xbf16, #tpu.memory_space<vmem>>, %arg7: memref<512x128xf32, #tpu.memory_space<vmem>>) attributes {dimension_semantics = [#tpu.dimension_semantics<parallel>, #tpu.dimension_semantics<parallel>, #tpu.dimension_semantics<arbitrary>], iteration_bounds = array<i64: 1, 1, 1>, scalar_prefetch = 0 : i64, scratch_operands = 1 : i64, tpu.core_type = #tpu.core_type<tc>, window_params = [{transform_indices = @transform_0, window_bounds = array<i64: 512, 27>}, {transform_indices = @transform_1, window_bounds = array<i64: 27, 128>}, {transform_indices = @transform_2, window_bounds = array<i64: 1, 128>}, {transform_indices = @transform_3, window_bounds = array<i64: 512, 128>}]} {
    %c0_i32 = arith.constant 0 : i32
    %0 = arith.cmpi eq, %arg2, %c0_i32 : i32
    %1 = arith.extui %0 : i1 to i32
    %c0_i32_0 = arith.constant 0 : i32
    %2 = arith.cmpi ne, %1, %c0_i32_0 : i32
    scf.if %2 {
      %cst_10 = arith.constant 0.000000e+00 : f32
      %12 = vector.broadcast %cst_10 : f32 to vector<512x128xf32>
      %c0_11 = arith.constant 0 : index
      %c0_12 = arith.constant 0 : index
      %13 = vector.load %arg7[%c0_11, %c0_12] : memref<512x128xf32, #tpu.memory_space<vmem>>, vector<512x128xf32>
      tpu.vector_store %arg7[%c0_11, %c0_12], %12 {strides = array<i32>} : memref<512x128xf32, #tpu.memory_space<vmem>>, vector<512x128xf32>,
    } else {
    }
    %c0 = arith.constant 0 : index
    %c0_1 = arith.constant 0 : index
    %3 = vector.load %arg7[%c0, %c0_1] : memref<512x128xf32, #tpu.memory_space<vmem>>, vector<512x128xf32>
    %c0_2 = arith.constant 0 : index
    %c0_3 = arith.constant 0 : index
    %4 = vector.load %arg3[%c0_2, %c0_3] : memref<512x27xbf16, #tpu.memory_space<vmem>>, vector<512x27xbf16>
    %c0_4 = arith.constant 0 : index
    %c0_5 = arith.constant 0 : index
    %5 = vector.load %arg4[%c0_4, %c0_5] : memref<27x128xbf16, #tpu.memory_space<vmem>>, vector<27x128xbf16>
    %cst = arith.constant dense<0.000000e+00> : vector<512x128xf32>
    %6 = tpu.matmul %4, %5, %cst {dimension_numbers = #tpu.dot_dimension_numbers<[1], [0], [0], [1], [0, 0, 1, 1], [], []>} : vector<512x27xbf16>, vector<27x128xbf16>, vector<512x128xf32> -> vector<512x128xf32>
    %7 = arith.addf %3, %6 : vector<512x128xf32>
    %c0_6 = arith.constant 0 : index
    %c0_7 = arith.constant 0 : index
    %8 = vector.load %arg7[%c0_6, %c0_7] : memref<512x128xf32, #tpu.memory_space<vmem>>, vector<512x128xf32>
    tpu.vector_store %arg7[%c0_6, %c0_7], %7 {strides = array<i32>} : memref<512x128xf32, #tpu.memory_space<vmem>>, vector<512x128xf32>,
    %c0_i32_8 = arith.constant 0 : i32
    %9 = arith.cmpi eq, %arg2, %c0_i32_8 : i32
    %10 = arith.extui %9 : i1 to i32
    %c0_i32_9 = arith.constant 0 : i32
    %11 = arith.cmpi ne, %10, %c0_i32_9 : i32
    scf.if %11 {
      %c0_10 = arith.constant 0 : index
      %c0_11 = arith.constant 0 : index
      %12 = vector.load %arg7[%c0_10, %c0_11] : memref<512x128xf32, #tpu.memory_space<vmem>>, vector<512x128xf32>
      %c0_12 = arith.constant 0 : index
      %c0_13 = arith.constant 0 : index
      %13 = vector.load %arg5[%c0_12, %c0_13] : memref<1x128xf32, #tpu.memory_space<vmem>>, vector<1x128xf32>
      %14 = vector.broadcast %13 : vector<1x128xf32> to vector<512x128xf32>
      %15 = arith.addf %12, %14 : vector<512x128xf32>
      %cst_14 = arith.constant 0.000000e+00 : f32
      %16 = vector.broadcast %cst_14 : f32 to vector<512x128xf32>
      %17 = arith.maximumf %15, %16 : vector<512x128xf32>
      %18 = arith.truncf %17 : vector<512x128xf32> to vector<512x128xbf16>
      %c0_15 = arith.constant 0 : index
      %c0_16 = arith.constant 0 : index
      %19 = vector.load %arg6[%c0_15, %c0_16] : memref<512x128xbf16, #tpu.memory_space<vmem>>, vector<512x128xbf16>
      tpu.vector_store %arg6[%c0_15, %c0_16], %18 {strides = array<i32>} : memref<512x128xbf16, #tpu.memory_space<vmem>>, vector<512x128xbf16>,
    } else {
    }
    return
  }
  func.func @transform_0(%arg0: i32, %arg1: i32, %arg2: i32) -> (i32, i32) {
    %c0_i32 = arith.constant 0 : i32
    return %arg0, %arg2 : i32, i32
  }
  func.func @transform_1(%arg0: i32, %arg1: i32, %arg2: i32) -> (i32, i32) {
    %c0_i32 = arith.constant 0 : i32
    return %arg2, %arg1 : i32, i32
  }
  func.func @transform_2(%arg0: i32, %arg1: i32, %arg2: i32) -> (i32, i32) {
    %c0_i32 = arith.constant 0 : i32
    %c0_i32_0 = arith.constant 0 : i32
    return %c0_i32, %arg1 : i32, i32
  }
  func.func @transform_3(%arg0: i32, %arg1: i32, %arg2: i32) -> (i32, i32) {
    %c0_i32 = arith.constant 0 : i32
    return %arg0, %arg1 : i32, i32
  }
}

</mosaic_0001>

<bundles_post_ra>
// kernel: tpu_custom_call.1
= control target key start
LH: loop header
LB: loop body
LE: loop exit
PB: predicated region body
PF: predicated region fallthrough
CT: control target
= control target key end

     0   :  { %vm484_vm0 = vcmask 1044480   ;;  %vm485_vm1 = vcmask 1045504   ;;  %v2000_v2 = vmov 65535   ;;  %vm387_vm2 = vcmask 220160   ;;  %s2239_s0 = inlined_call_operand.vmem [shape: bf16[512,27], index: 0, kind: input, shape index: {}]   ;;  %s2240_s1 = inlined_call_operand.vmem [shape: bf16[27,128], index: 1, kind: input, shape index: {}]   ;;  %s2241_s2 = inlined_call_operand.vmem [shape: f32[1,128], index: 2, kind: input, shape index: {}]   ;;  %s2242_s3 = inlined_call_operand.hbm [shape: bf16[512,128], index: 3, kind: output, shape index: {}]  }
   0x1   :  { %v1942_v0 = vld [vmem:[%s2240_s1] sm:$0xff]   ;;  %v1943_v1 = vld [vmem:[%s2240_s1 + $0x8] sm:$0x3f]   ;;  %v486_v3 = vsel %vm484_vm0, 4294967295, %v2000_v2  ;;  %v1948_v10 = vld [vmem:[%s2239_s0 + $0x10] sm:$0xff]  }
   0x2   :  { %1866 = vmatprep.subr.bf16.mxu0 %v1942_v0  ;;  %1934 = vmatprep.subr.bf16.mxu1 %v1942_v0  ;;  %v1944_v4 = vld [vmem:[%s2239_s0] sm:$0xff]   ;;  %v487_v6 = vsel %vm485_vm1, %v486_v3, 0  ;;  %v1946_v8 = vld [vmem:[%s2239_s0 + $0x8] sm:$0xff]   ;;  %v1949_v11 = vld [vmem:[%s2239_s0 + $0x90] sm:$0xff]  }
   0x3   :  { %1867 = vmatpush3.bf16.msra.mxu0 %v1942_v0  ;;  %1936 = vmatpush3.bf16.msra.mxu1 %v1942_v0  ;;  %v1945_v5 = vld [vmem:[%s2239_s0 + $0x80] sm:$0xff]   ;;  %v489_v7 = vand.u32 %v1943_v1, %v487_v6  ;;  %v1947_v9 = vld [vmem:[%s2239_s0 + $0x88] sm:$0xff]   ;;  %v1950_v12 = vld [vmem:[%s2239_s0 + $0x18] sm:$0xff]  }
   0x4   :  { %1870 = vmatprep.mubr.msk.bf16.mxu0 %vm387_vm2, %v1944_v4  ;;  %1902 = vmatprep.mubr.msk.bf16.mxu1 %vm387_vm2, %v1945_v5  ;;  %v1951_v13 = vld [vmem:[%s2239_s0 + $0x98] sm:$0xff]   ;;  %v1952_v14 = vld [vmem:[%s2239_s0 + $0x20] sm:$0xff]   ;;  %v1954_v16 = vld [vmem:[%s2239_s0 + $0x28] sm:$0xff]  }
   0x5   :  { %1868 = vmatprep.subr.bf16.mxu0 %v489_v7  ;;  %1935 = vmatprep.subr.bf16.mxu1 %v489_v7  ;;  %v1953_v15 = vld [vmem:[%s2239_s0 + $0xa0] sm:$0xff]   ;;  %v1955_v17 = vld [vmem:[%s2239_s0 + $0xa8] sm:$0xff]   ;;  %v1956_v18 = vld [vmem:[%s2239_s0 + $0x30] sm:$0xff]  }
   0x6   :  { %v1957_v19 = vld [vmem:[%s2239_s0 + $0xb0] sm:$0xff]   ;;  %v1958_v20 = vld [vmem:[%s2239_s0 + $0x38] sm:$0xff]   ;;  %v1960_v22 = vld [vmem:[%s2239_s0 + $0x40] sm:$0xff]  }
   0x7   :  { %1869 = vmatpush3.bf16.msra.mxu0 %v489_v7  ;;  %1937 = vmatpush3.bf16.msra.mxu1 %v489_v7  ;;  %v1959_v21 = vld [vmem:[%s2239_s0 + $0xb8] sm:$0xff]   ;;  %v1961_v23 = vld [vmem:[%s2239_s0 + $0xc0] sm:$0xff]  }
   0xa   :  { %1871 = vmatmul.mubr.msk.bf16.vlgmr.msra.gmra.mrb[0].mxu0 %vm387_vm2, %v1946_v8  ;;  %1903 = vmatmul.mubr.msk.bf16.vlgmr.msra.gmra.mrb[0].mxu1 %vm387_vm2, %v1947_v9 }
   0xb   :  { %1874 = vmatprep.mubr.msk.bf16.mxu0 %vm387_vm2, %v1948_v10  ;;  %1906 = vmatprep.mubr.msk.bf16.mxu1 %vm387_vm2, %v1949_v11 }
  0x12   :  { %1875 = vmatmul.mubr.msk.bf16.gmra.mrb[4].mxu0 %vm387_vm2, %v1950_v12  ;;  %1907 = vmatmul.mubr.msk.bf16.gmra.mrb[4].mxu1 %vm387_vm2, %v1951_v13 }
  0x13   :  { %1878 = vmatprep.mubr.msk.bf16.mxu0 %vm387_vm2, %v1952_v14  ;;  %1910 = vmatprep.mubr.msk.bf16.mxu1 %vm387_vm2, %v1953_v15 }
  0x1a   :  { %1879 = vmatmul.mubr.msk.bf16.gmra.mrb[8].mxu0 %vm387_vm2, %v1954_v16  ;;  %1911 = vmatmul.mubr.msk.bf16.gmra.mrb[8].mxu1 %vm387_vm2, %v1955_v17 }
  0x1b   :  { %1882 = vmatprep.mubr.msk.bf16.mxu0 %vm387_vm2, %v1956_v18  ;;  %1914 = vmatprep.mubr.msk.bf16.mxu1 %vm387_vm2, %v1957_v19 }
  0x1c   :  { %8 = vsyncpa [#allocation4], 0  ;;  %v1962_v24 = vld [vmem:[%s2239_s0 + $0x48] sm:$0xff]   ;;  %v1964_v26 = vld [vmem:[%s2239_s0 + $0x50] sm:$0xff]  }
  0x1d   :  { %v1963_v25 = vld [vmem:[%s2239_s0 + $0xc8] sm:$0xff]   ;;  %v1965_v27 = vld [vmem:[%s2239_s0 + $0xd0] sm:$0xff]   ;;  %v1966_v28 = vld [vmem:[%s2239_s0 + $0x58] sm:$0xff]  }
  0x1e   :  { %v1967_v29 = vld [vmem:[%s2239_s0 + $0xd8] sm:$0xff]   ;;  %v1968_v30 = vld [vmem:[%s2239_s0 + $0x60] sm:$0xff]   ;;  %v1970_v32 = vld [vmem:[%s2239_s0 + $0x68] sm:$0xff]  }
  0x1f   :  { %v1969_v31 = vld [vmem:[%s2239_s0 + $0xe0] sm:$0xff]   ;;  %v1971_v33 = vld [vmem:[%s2239_s0 + $0xe8] sm:$0xff]   ;;  %v1972_v34 = vld [vmem:[%s2239_s0 + $0x70] sm:$0xff]  }
  0x20   :  { %v1973_v35 = vld [vmem:[%s2239_s0 + $0xf0] sm:$0xff]   ;;  %v1974_v36 = vld [vmem:[%s2239_s0 + $0x78] sm:$0xff]   ;;  %v2161_v38 = vld [vmem:[%s2241_s2] ss:$0 sm:$0xff] }
  0x21   :  { %v1975_v37 = vld [vmem:[%s2239_s0 + $0xf8] sm:$0xff]   ;;  %s2001_s0 = smov [#allocation3]  }
  0x22   :  { %1883 = vmatmul.mubr.msk.bf16.gmra.mrb[12].mxu0 %vm387_vm2, %v1958_v20  ;;  %1915 = vmatmul.mubr.msk.bf16.gmra.mrb[12].mxu1 %vm387_vm2, %v1959_v21  ;;  %s1435_s2 = sshll.u32 %s2001_s0, 4  ;;  %s1436_s2 = int_to_ptr.vmem [resolvable:$true] %s1435_s2 }
  0x23   :  { %1886 = vmatprep.mubr.msk.bf16.mxu0 %vm387_vm2, %v1960_v22  ;;  %1918 = vmatprep.mubr.msk.bf16.mxu1 %vm387_vm2, %v1961_v23  ;;  %s1976_s25 = scalar_lea.vmem %s1436_s2, 4096  ;;  %p1981_p1 = scmp.lt.s32.totalorder %s1436_s2, %s1436_s2 }
  0x24   :  { %p1977_p0 = scmp.ne.s32.totalorder %s1436_s2, %s1976_s25  ;;  %p1982_p2 = scmp.lt.s32.totalorder %s1976_s25, %s1976_s25 }
  0x26   :  { %p1983_p3 = por %p1982_p2, %p1981_p1 }
  0x28   :  { %p1984_p4 = pnand %p1983_p3, %p1977_p0 }
  0x2a   :  { %1887 = vmatmul.mubr.msk.bf16.gmra.mrb[16].mxu0 %vm387_vm2, %v1962_v24  ;;  %1919 = vmatmul.mubr.msk.bf16.gmra.mrb[16].mxu1 %vm387_vm2, %v1963_v25 }
  0x2b   :  { %1890 = vmatprep.mubr.msk.bf16.mxu0 %vm387_vm2, %v1964_v26  ;;  %1922 = vmatprep.mubr.msk.bf16.mxu1 %vm387_vm2, %v1965_v27 }
  0x32   :  { %1891 = vmatmul.mubr.msk.bf16.gmra.mrb[20].mxu0 %vm387_vm2, %v1966_v28  ;;  %1923 = vmatmul.mubr.msk.bf16.gmra.mrb[20].mxu1 %vm387_vm2, %v1967_v29 }
  0x33   :  { %1894 = vmatprep.mubr.msk.bf16.mxu0 %vm387_vm2, %v1968_v30  ;;  %1926 = vmatprep.mubr.msk.bf16.mxu1 %vm387_vm2, %v1969_v31 }
  0x3a   :  { %1895 = vmatmul.mubr.msk.bf16.gmra.mrb[24].mxu0 %vm387_vm2, %v1970_v32  ;;  %1927 = vmatmul.mubr.msk.bf16.gmra.mrb[24].mxu1 %vm387_vm2, %v1971_v33 }
  0x3b   :  { %1898 = vmatprep.mubr.msk.bf16.mxu0 %vm387_vm2, %v1972_v34  ;;  %1930 = vmatprep.mubr.msk.bf16.mxu1 %vm387_vm2, %v1973_v35 }
  0x42   :  { %1899 = vmatmul.mubr.msk.bf16.gmra.mrb[28].mxu0 %vm387_vm2, %v1974_v36  ;;  %1931 = vmatmul.mubr.msk.bf16.gmra.mrb[28].mxu1 %vm387_vm2, %v1975_v37 }
  0xdd   :  { %v1872_v39 = vpop.f32.mrb[0].mxu0  ;;  %v1904_v40 = vpop.f32.mrb[0].mxu1 }
  0xde   :  { %v984_v41 = vadd.f32 %v1872_v39, %v2161_v38  ;;  %v1016_v42 = vadd.f32 %v1904_v40, %v2161_v38  ;;  %v525_v43 = vpop.f32.mrb[1].mxu0  ;;  %v653_v44 = vpop.f32.mrb[1].mxu1 }
  0xdf   :  { %v982_v45 = vadd.f32 %v2161_v38, %v525_v43  ;;  %v1014_v46 = vadd.f32 %v2161_v38, %v653_v44  ;;  %v1873_v47 = vpop.f32.mrb[2].mxu0  ;;  %v1905_v48 = vpop.f32.mrb[2].mxu1 }
  0xe0   :  { %v985_v49 = vadd.f32 %v1873_v47, %v2161_v38  ;;  %v1017_v50 = vadd.f32 %v1905_v48, %v2161_v38  ;;  %v528_v51 = vpop.f32.mrb[3].mxu0  ;;  %v656_v52 = vpop.f32.mrb[3].mxu1  ;;  %v1048_v55 = vmax.f32 %v984_v41, 0.0  ;;  %v1080_v56 = vmax.f32 %v1016_v42, 0.0 }
  0xe1   :  { %v983_v53 = vadd.f32 %v2161_v38, %v528_v51  ;;  %v1015_v54 = vadd.f32 %v2161_v38, %v656_v52  ;;  %v1046_v59 = vmax.f32 %v982_v45, 0.0  ;;  %v1078_v60 = vmax.f32 %v1014_v46, 0.0 }
  0xe2   :  { %v1049_v57 = vmax.f32 %v985_v49, 0.0  ;;  %v1081_v58 = vmax.f32 %v1017_v50, 0.0 }
  0xe3   :  { %v1047_v61 = vmax.f32 %v983_v53, 0.0  ;;  %v1079_v62 = vmax.f32 %v1015_v54, 0.0 }
  0xe4   :  { %v1649_v63 = vpack.c.bf16 %v1049_v57, %v1048_v55  ;;  %v1729_v0 = vpack.c.bf16 %v1081_v58, %v1080_v56 }
  0xe5   :  { %v1644_v1 = vpack.c.bf16 %v1047_v61, %v1046_v59  ;;  %v1724_v2 = vpack.c.bf16 %v1079_v62, %v1078_v60  ;;  %v1876_v3 = vpop.f32.mrb[4].mxu0  ;;  %v1908_v4 = vpop.f32.mrb[4].mxu1 }
  0xe6   :  { %1801 = vst [vmem:[#allocation3 + $0x8] sm:$0xff] %v1649_v63   ;;  %1817 = vst [vmem:[#allocation3 + $0x88] sm:$0xff] %v1729_v0   ;;  %v988_v5 = vadd.f32 %v1876_v3, %v2161_v38  ;;  %v1020_v6 = vadd.f32 %v1908_v4, %v2161_v38  ;;  %v541_v7 = vpop.f32.mrb[5].mxu0  ;;  %v669_v8 = vpop.f32.mrb[5].mxu1 }
  0xe7   :  { %1645 = vst [vmem:[#allocation3] sm:$0xff] %v1644_v1   ;;  %1816 = vst [vmem:[#allocation3 + $0x80] sm:$0xff] %v1724_v2   ;;  %v986_v9 = vadd.f32 %v2161_v38, %v541_v7  ;;  %v1018_v10 = vadd.f32 %v2161_v38, %v669_v8  ;;  %v1877_v11 = vpop.f32.mrb[6].mxu0  ;;  %v1909_v12 = vpop.f32.mrb[6].mxu1 }
  0xe8   :  { %v989_v13 = vadd.f32 %v1877_v11, %v2161_v38  ;;  %v1021_v14 = vadd.f32 %v1909_v12, %v2161_v38  ;;  %v544_v15 = vpop.f32.mrb[7].mxu0  ;;  %v672_v16 = vpop.f32.mrb[7].mxu1  ;;  %v1052_v19 = vmax.f32 %v988_v5, 0.0  ;;  %v1084_v20 = vmax.f32 %v1020_v6, 0.0 }
  0xe9   :  { %v987_v17 = vadd.f32 %v2161_v38, %v544_v15  ;;  %v1019_v18 = vadd.f32 %v2161_v38, %v672_v16  ;;  %v1050_v23 = vmax.f32 %v986_v9, 0.0  ;;  %v1082_v24 = vmax.f32 %v1018_v10, 0.0 }
  0xea   :  { %v1053_v21 = vmax.f32 %v989_v13, 0.0  ;;  %v1085_v22 = vmax.f32 %v1021_v14, 0.0 }
  0xeb   :  { %v1051_v25 = vmax.f32 %v987_v17, 0.0  ;;  %v1083_v26 = vmax.f32 %v1019_v18, 0.0 }
  0xec   :  { %v1659_v27 = vpack.c.bf16 %v1053_v21, %v1052_v19  ;;  %v1739_v28 = vpack.c.bf16 %v1085_v22, %v1084_v20 }
  0xed   :  { %v1654_v29 = vpack.c.bf16 %v1051_v25, %v1050_v23  ;;  %v1734_v30 = vpack.c.bf16 %v1083_v26, %v1082_v24  ;;  %v1880_v31 = vpop.f32.mrb[8].mxu0  ;;  %v1912_v32 = vpop.f32.mrb[8].mxu1 }
  0xee   :  { %1803 = vst [vmem:[#allocation3 + $0x18] sm:$0xff] %v1659_v27   ;;  %1819 = vst [vmem:[#allocation3 + $0x98] sm:$0xff] %v1739_v28   ;;  %v992_v33 = vadd.f32 %v1880_v31, %v2161_v38  ;;  %v1024_v34 = vadd.f32 %v1912_v32, %v2161_v38  ;;  %v557_v35 = vpop.f32.mrb[9].mxu0  ;;  %v685_v36 = vpop.f32.mrb[9].mxu1 }
  0xef   :  { %1802 = vst [vmem:[#allocation3 + $0x10] sm:$0xff] %v1654_v29   ;;  %1818 = vst [vmem:[#allocation3 + $0x90] sm:$0xff] %v1734_v30   ;;  %v990_v37 = vadd.f32 %v2161_v38, %v557_v35  ;;  %v1022_v39 = vadd.f32 %v2161_v38, %v685_v36  ;;  %v1881_v40 = vpop.f32.mrb[10].mxu0  ;;  %v1913_v41 = vpop.f32.mrb[10].mxu1 }
  0xf0   :  { %v993_v42 = vadd.f32 %v1881_v40, %v2161_v38  ;;  %v1025_v43 = vadd.f32 %v1913_v41, %v2161_v38  ;;  %v560_v44 = vpop.f32.mrb[11].mxu0  ;;  %v688_v45 = vpop.f32.mrb[11].mxu1  ;;  %v1056_v48 = vmax.f32 %v992_v33, 0.0  ;;  %v1088_v49 = vmax.f32 %v1024_v34, 0.0 }
  0xf1   :  { %v991_v46 = vadd.f32 %v2161_v38, %v560_v44  ;;  %v1023_v47 = vadd.f32 %v2161_v38, %v688_v45  ;;  %v1054_v52 = vmax.f32 %v990_v37, 0.0  ;;  %v1086_v53 = vmax.f32 %v1022_v39, 0.0 }
  0xf2   :  { %v1057_v50 = vmax.f32 %v993_v42, 0.0  ;;  %v1089_v51 = vmax.f32 %v1025_v43, 0.0 }
  0xf3   :  { %v1055_v54 = vmax.f32 %v991_v46, 0.0  ;;  %v1087_v55 = vmax.f32 %v1023_v47, 0.0 }
  0xf4   :  { %v1669_v56 = vpack.c.bf16 %v1057_v50, %v1056_v48  ;;  %v1749_v57 = vpack.c.bf16 %v1089_v51, %v1088_v49 }
  0xf5   :  { %v1664_v58 = vpack.c.bf16 %v1055_v54, %v1054_v52  ;;  %v1744_v59 = vpack.c.bf16 %v1087_v55, %v1086_v53  ;;  %v1884_v60 = vpop.f32.mrb[12].mxu0  ;;  %v1916_v61 = vpop.f32.mrb[12].mxu1 }
  0xf6   :  { %1805 = vst [vmem:[#allocation3 + $0x28] sm:$0xff] %v1669_v56   ;;  %1821 = vst [vmem:[#allocation3 + $0xa8] sm:$0xff] %v1749_v57   ;;  %v996_v62 = vadd.f32 %v1884_v60, %v2161_v38  ;;  %v1028_v63 = vadd.f32 %v1916_v61, %v2161_v38  ;;  %v573_v0 = vpop.f32.mrb[13].mxu0  ;;  %v701_v1 = vpop.f32.mrb[13].mxu1 }
  0xf7   :  { %1804 = vst [vmem:[#allocation3 + $0x20] sm:$0xff] %v1664_v58   ;;  %1820 = vst [vmem:[#allocation3 + $0xa0] sm:$0xff] %v1744_v59   ;;  %v994_v2 = vadd.f32 %v2161_v38, %v573_v0  ;;  %v1026_v3 = vadd.f32 %v2161_v38, %v701_v1  ;;  %v1885_v4 = vpop.f32.mrb[14].mxu0  ;;  %v1917_v5 = vpop.f32.mrb[14].mxu1 }
  0xf8   :  { %v997_v6 = vadd.f32 %v1885_v4, %v2161_v38  ;;  %v1029_v7 = vadd.f32 %v1917_v5, %v2161_v38  ;;  %v576_v8 = vpop.f32.mrb[15].mxu0  ;;  %v704_v9 = vpop.f32.mrb[15].mxu1  ;;  %v1060_v12 = vmax.f32 %v996_v62, 0.0  ;;  %v1092_v13 = vmax.f32 %v1028_v63, 0.0 }
  0xf9   :  { %v995_v10 = vadd.f32 %v2161_v38, %v576_v8  ;;  %v1027_v11 = vadd.f32 %v2161_v38, %v704_v9  ;;  %v1058_v16 = vmax.f32 %v994_v2, 0.0  ;;  %v1090_v17 = vmax.f32 %v1026_v3, 0.0 }
  0xfa   :  { %v1061_v14 = vmax.f32 %v997_v6, 0.0  ;;  %v1093_v15 = vmax.f32 %v1029_v7, 0.0 }
  0xfb   :  { %v1059_v18 = vmax.f32 %v995_v10, 0.0  ;;  %v1091_v19 = vmax.f32 %v1027_v11, 0.0 }
  0xfc   :  { %v1679_v20 = vpack.c.bf16 %v1061_v14, %v1060_v12  ;;  %v1759_v21 = vpack.c.bf16 %v1093_v15, %v1092_v13 }
  0xfd   :  { %v1674_v22 = vpack.c.bf16 %v1059_v18, %v1058_v16  ;;  %v1754_v23 = vpack.c.bf16 %v1091_v19, %v1090_v17  ;;  %v1888_v24 = vpop.f32.mrb[16].mxu0  ;;  %v1920_v25 = vpop.f32.mrb[16].mxu1 }
  0xfe   :  { %1807 = vst [vmem:[#allocation3 + $0x38] sm:$0xff] %v1679_v20   ;;  %1823 = vst [vmem:[#allocation3 + $0xb8] sm:$0xff] %v1759_v21   ;;  %v1000_v26 = vadd.f32 %v1888_v24, %v2161_v38  ;;  %v1032_v27 = vadd.f32 %v1920_v25, %v2161_v38  ;;  %v589_v28 = vpop.f32.mrb[17].mxu0  ;;  %v717_v29 = vpop.f32.mrb[17].mxu1 }
  0xff   :  { %1806 = vst [vmem:[#allocation3 + $0x30] sm:$0xff] %v1674_v22   ;;  %1822 = vst [vmem:[#allocation3 + $0xb0] sm:$0xff] %v1754_v23   ;;  %v998_v30 = vadd.f32 %v2161_v38, %v589_v28  ;;  %v1030_v31 = vadd.f32 %v2161_v38, %v717_v29  ;;  %v1889_v32 = vpop.f32.mrb[18].mxu0  ;;  %v1921_v33 = vpop.f32.mrb[18].mxu1 }
 0x100   :  { %v1001_v34 = vadd.f32 %v1889_v32, %v2161_v38  ;;  %v1033_v35 = vadd.f32 %v1921_v33, %v2161_v38  ;;  %v592_v36 = vpop.f32.mrb[19].mxu0  ;;  %v720_v37 = vpop.f32.mrb[19].mxu1  ;;  %v1064_v41 = vmax.f32 %v1000_v26, 0.0  ;;  %v1096_v42 = vmax.f32 %v1032_v27, 0.0 }
 0x101   :  { %v999_v39 = vadd.f32 %v2161_v38, %v592_v36  ;;  %v1031_v40 = vadd.f32 %v2161_v38, %v720_v37  ;;  %v1062_v45 = vmax.f32 %v998_v30, 0.0  ;;  %v1094_v46 = vmax.f32 %v1030_v31, 0.0 }
 0x102   :  { %v1065_v43 = vmax.f32 %v1001_v34, 0.0  ;;  %v1097_v44 = vmax.f32 %v1033_v35, 0.0 }
 0x103   :  { %v1063_v47 = vmax.f32 %v999_v39, 0.0  ;;  %v1095_v48 = vmax.f32 %v1031_v40, 0.0 }
 0x104   :  { %v1689_v49 = vpack.c.bf16 %v1065_v43, %v1064_v41  ;;  %v1769_v50 = vpack.c.bf16 %v1097_v44, %v1096_v42 }
 0x105   :  { %v1684_v51 = vpack.c.bf16 %v1063_v47, %v1062_v45  ;;  %v1764_v52 = vpack.c.bf16 %v1095_v48, %v1094_v46  ;;  %v1892_v53 = vpop.f32.mrb[20].mxu0  ;;  %v1924_v54 = vpop.f32.mrb[20].mxu1 }
 0x106   :  { %1809 = vst [vmem:[#allocation3 + $0x48] sm:$0xff] %v1689_v49   ;;  %1825 = vst [vmem:[#allocation3 + $0xc8] sm:$0xff] %v1769_v50   ;;  %v1004_v55 = vadd.f32 %v1892_v53, %v2161_v38  ;;  %v1036_v56 = vadd.f32 %v1924_v54, %v2161_v38  ;;  %v605_v57 = vpop.f32.mrb[21].mxu0  ;;  %v733_v58 = vpop.f32.mrb[21].mxu1 }
 0x107   :  { %1808 = vst [vmem:[#allocation3 + $0x40] sm:$0xff] %v1684_v51   ;;  %1824 = vst [vmem:[#allocation3 + $0xc0] sm:$0xff] %v1764_v52   ;;  %v1002_v59 = vadd.f32 %v2161_v38, %v605_v57  ;;  %v1034_v60 = vadd.f32 %v2161_v38, %v733_v58  ;;  %v1893_v61 = vpop.f32.mrb[22].mxu0  ;;  %v1925_v62 = vpop.f32.mrb[22].mxu1 }
 0x108   :  { %v1005_v63 = vadd.f32 %v1893_v61, %v2161_v38  ;;  %v1037_v0 = vadd.f32 %v1925_v62, %v2161_v38  ;;  %v608_v1 = vpop.f32.mrb[23].mxu0  ;;  %v736_v2 = vpop.f32.mrb[23].mxu1  ;;  %v1068_v5 = vmax.f32 %v1004_v55, 0.0  ;;  %v1100_v6 = vmax.f32 %v1036_v56, 0.0 }
 0x109   :  { %v1003_v3 = vadd.f32 %v2161_v38, %v608_v1  ;;  %v1035_v4 = vadd.f32 %v2161_v38, %v736_v2  ;;  %v1066_v9 = vmax.f32 %v1002_v59, 0.0  ;;  %v1098_v10 = vmax.f32 %v1034_v60, 0.0 }
 0x10a   :  { %v1069_v7 = vmax.f32 %v1005_v63, 0.0  ;;  %v1101_v8 = vmax.f32 %v1037_v0, 0.0 }
 0x10b   :  { %v1067_v11 = vmax.f32 %v1003_v3, 0.0  ;;  %v1099_v12 = vmax.f32 %v1035_v4, 0.0 }
 0x10c   :  { %v1699_v13 = vpack.c.bf16 %v1069_v7, %v1068_v5  ;;  %v1779_v14 = vpack.c.bf16 %v1101_v8, %v1100_v6 }
 0x10d   :  { %v1694_v15 = vpack.c.bf16 %v1067_v11, %v1066_v9  ;;  %v1774_v16 = vpack.c.bf16 %v1099_v12, %v1098_v10  ;;  %v1896_v17 = vpop.f32.mrb[24].mxu0  ;;  %v1928_v18 = vpop.f32.mrb[24].mxu1 }
 0x10e   :  { %1811 = vst [vmem:[#allocation3 + $0x58] sm:$0xff] %v1699_v13   ;;  %1827 = vst [vmem:[#allocation3 + $0xd8] sm:$0xff] %v1779_v14   ;;  %v1008_v19 = vadd.f32 %v1896_v17, %v2161_v38  ;;  %v1040_v20 = vadd.f32 %v1928_v18, %v2161_v38  ;;  %v621_v21 = vpop.f32.mrb[25].mxu0  ;;  %v749_v22 = vpop.f32.mrb[25].mxu1 }
 0x10f   :  { %1810 = vst [vmem:[#allocation3 + $0x50] sm:$0xff] %v1694_v15   ;;  %1826 = vst [vmem:[#allocation3 + $0xd0] sm:$0xff] %v1774_v16   ;;  %v1006_v23 = vadd.f32 %v2161_v38, %v621_v21  ;;  %v1038_v24 = vadd.f32 %v2161_v38, %v749_v22  ;;  %v1897_v25 = vpop.f32.mrb[26].mxu0  ;;  %v1929_v26 = vpop.f32.mrb[26].mxu1 }
 0x110   :  { %v1009_v27 = vadd.f32 %v1897_v25, %v2161_v38  ;;  %v1041_v28 = vadd.f32 %v1929_v26, %v2161_v38  ;;  %v624_v29 = vpop.f32.mrb[27].mxu0  ;;  %v752_v30 = vpop.f32.mrb[27].mxu1  ;;  %v1072_v33 = vmax.f32 %v1008_v19, 0.0  ;;  %v1104_v34 = vmax.f32 %v1040_v20, 0.0 }
 0x111   :  { %v1007_v31 = vadd.f32 %v2161_v38, %v624_v29  ;;  %v1039_v32 = vadd.f32 %v2161_v38, %v752_v30  ;;  %v1070_v37 = vmax.f32 %v1006_v23, 0.0  ;;  %v1102_v39 = vmax.f32 %v1038_v24, 0.0 }
 0x112   :  { %v1073_v35 = vmax.f32 %v1009_v27, 0.0  ;;  %v1105_v36 = vmax.f32 %v1041_v28, 0.0 }
 0x113   :  { %v1071_v40 = vmax.f32 %v1007_v31, 0.0  ;;  %v1103_v41 = vmax.f32 %v1039_v32, 0.0 }
 0x114   :  { %v1709_v42 = vpack.c.bf16 %v1073_v35, %v1072_v33  ;;  %v1789_v43 = vpack.c.bf16 %v1105_v36, %v1104_v34 }
 0x115   :  { %v1704_v44 = vpack.c.bf16 %v1071_v40, %v1070_v37  ;;  %v1784_v45 = vpack.c.bf16 %v1103_v41, %v1102_v39  ;;  %v1900_v46 = vpop.f32.mrb[28].mxu0  ;;  %v1932_v47 = vpop.f32.mrb[28].mxu1 }
 0x116   :  { %1813 = vst [vmem:[#allocation3 + $0x68] sm:$0xff] %v1709_v42   ;;  %1829 = vst [vmem:[#allocation3 + $0xe8] sm:$0xff] %v1789_v43   ;;  %v1012_v48 = vadd.f32 %v1900_v46, %v2161_v38  ;;  %v1044_v49 = vadd.f32 %v1932_v47, %v2161_v38  ;;  %v637_v50 = vpop.f32.mrb[29].mxu0  ;;  %v765_v51 = vpop.f32.mrb[29].mxu1 }
 0x117   :  { %1812 = vst [vmem:[#allocation3 + $0x60] sm:$0xff] %v1704_v44   ;;  %1828 = vst [vmem:[#allocation3 + $0xe0] sm:$0xff] %v1784_v45   ;;  %v1010_v52 = vadd.f32 %v2161_v38, %v637_v50  ;;  %v1042_v53 = vadd.f32 %v2161_v38, %v765_v51  ;;  %v1901_v54 = vpop.f32.mrb[30].mxu0  ;;  %v1933_v55 = vpop.f32.mrb[30].mxu1 }
 0x118   :  { %v1013_v56 = vadd.f32 %v1901_v54, %v2161_v38  ;;  %v1045_v57 = vadd.f32 %v1933_v55, %v2161_v38  ;;  %v640_v58 = vpop.f32.mrb[31].mxu0  ;;  %v768_v59 = vpop.f32.mrb[31].mxu1  ;;  %v1076_v62 = vmax.f32 %v1012_v48, 0.0  ;;  %v1108_v63 = vmax.f32 %v1044_v49, 0.0 }
 0x119   :  { %v1011_v60 = vadd.f32 %v2161_v38, %v640_v58  ;;  %v1043_v61 = vadd.f32 %v2161_v38, %v768_v59  ;;  %v1074_v2 = vmax.f32 %v1010_v52, 0.0  ;;  %v1106_v3 = vmax.f32 %v1042_v53, 0.0 }
 0x11a   :  { %v1077_v0 = vmax.f32 %v1013_v56, 0.0  ;;  %v1109_v1 = vmax.f32 %v1045_v57, 0.0 }
 0x11b   :  { %v1075_v4 = vmax.f32 %v1011_v60, 0.0  ;;  %v1107_v5 = vmax.f32 %v1043_v61, 0.0 }
 0x11c   :  { %v1719_v6 = vpack.c.bf16 %v1077_v0, %v1076_v62  ;;  %v1799_v7 = vpack.c.bf16 %v1109_v1, %v1108_v63 }
 0x11d   :  { %v1714_v8 = vpack.c.bf16 %v1075_v4, %v1074_v2  ;;  %v1794_v9 = vpack.c.bf16 %v1107_v5, %v1106_v3 }
 0x11e   :  { %1815 = vst [vmem:[#allocation3 + $0x78] sm:$0xff] %v1719_v6   ;;  %1831 = vst [vmem:[#allocation3 + $0xf8] sm:$0xff] %v1799_v7  }
 0x11f   :  { %1814 = vst [vmem:[#allocation3 + $0x70] sm:$0xff] %v1714_v8   ;;  %1830 = vst [vmem:[#allocation3 + $0xf0] sm:$0xff] %v1794_v9  }
 0x120   :  { %1987 = shalt.err (!%p1984_p4)
}
 0x121   :  { %s1988_s28 = scalar_lea.hbm %s2242_s3, 4096 }
 0x122   :  { %p1989_p5 = scmp.ne.s32.totalorder %s2242_s3, %s1988_s28  ;;  %p1992_p6 = scmp.lt.u32.totalorder %s1988_s28, %s2242_s3 }
 0x124   :  { %p1994_p7 = pnand %p1992_p6, %p1989_p5 }
 0x126   :  { %1997 = shalt.err (!%p1994_p7)
}
 0x127   :  { %s2002_s6 = smov 64   ;;  %s2003_s7 = smov 4  }
 0x128   :  { %1441 = dma.vmem_to_hbm [thread:$0]  %s1436_s2, 4096, %s2242_s3, [#allocation4], %s2002_s6, %s2002_s6, %s2003_s7  }
 0x129   :  { %1998 = dma.done.wait [#allocation4], 4096  }
 0x12a   :  { %1999 = vsyncadd [#allocation4], 4294963200 }
 0x12b   :  { %1445 = vsyncpa [#allocation4], 1 }

</bundles_post_ra>
